<compile_context>
chip_gen: v7x
topology: tpu7x:2x2x1
jax: 0.10.0
libtpu: 0.0.40
codegen_flags: <defaults>
</compile_context>

<pallas_src>
import math

import jax
import jax.numpy as jnp
from jax.experimental import pallas as pl
from jax.experimental.pallas import tpu as pltpu

NEG_BIG = -1e30  # additive key-padding bias (Python float, not a jax array)


def _round_up(x: int, m: int) -> int:
    return ((x + m - 1) // m) * m


def _pad2(x, rows: int, cols: int):
    pr, pc = rows - x.shape[0], cols - x.shape[1]
    if pr == 0 and pc == 0:
        return x
    return jnp.pad(x, ((0, pr), (0, pc)))


def _tile_caps():
    """256-wide tiles feed the 256x256 MXU on v6e/v7x; v5e's MXU is 128x128."""
    try:
        kind = jax.devices()[0].device_kind.lower()
    except Exception:
        return 256, 256
    if "v5 lite" in kind or "v5e" in kind or "v5lite" in kind:
        return 128, 128
    return 256, 256


# ---------------------------------------------------------------------------
# Linear projection kernel: y = (x @ W + b) * scale, stored as bf16.
# ---------------------------------------------------------------------------
def _make_proj_kernel(scale: float):
    def proj_kernel(x_ref, w_ref, b_ref, o_ref):
        y = jnp.dot(x_ref[...], w_ref[...],
                    preferred_element_type=jnp.float32) + b_ref[...]
        if scale != 1.0:
            y = y * scale
        o_ref[...] = y.astype(o_ref.dtype)
    return proj_kernel


def _linear_project(x, w, b, *, scale=1.0, row_tile):
    """x:[N_P,IN_P] bf16, w:[IN_P,OUT_P] bf16, b:[1,OUT_P] f32 -> bf16 [N_P,OUT_P]."""
    n_p, in_p = x.shape
    out_p = w.shape[1]
    return pl.pallas_call(
        _make_proj_kernel(scale),
        out_shape=jax.ShapeDtypeStruct((n_p, out_p), jnp.bfloat16),
        grid_spec=pltpu.PrefetchScalarGridSpec(
            num_scalar_prefetch=0,
            grid=(n_p // row_tile,),
            in_specs=[
                pl.BlockSpec((row_tile, in_p), lambda i: (i, 0)),
                pl.BlockSpec((in_p, out_p), lambda i: (0, 0)),
                pl.BlockSpec((1, out_p), lambda i: (0, 0)),
            ],
            out_specs=pl.BlockSpec((row_tile, out_p), lambda i: (i, 0)),
        ),
        compiler_params=pltpu.CompilerParams(
            dimension_semantics=("parallel",)),
    )(x, w, b)


# ---------------------------------------------------------------------------
# Flash-style attention kernel over projected Q/K/V.
# ---------------------------------------------------------------------------
def _make_attention_kernel(n_k_tiles: int, tk: int, out_p: int, has_kbias: bool):
    reps_k = tk // 128
    reps_o = out_p // 128

    def _lanes(x, reps):
        # Broadcast a lane-replicated (TQ,128) stat to (TQ, reps*128).
        return x if reps == 1 else jnp.tile(x, (1, reps))

    def attn_kernel(*refs):
        if has_kbias:
            qp_ref, kp_ref, vp_ref, kbias_ref, o_ref, m_sc, l_sc, acc_sc = refs
        else:
            qp_ref, kp_ref, vp_ref, o_ref, m_sc, l_sc, acc_sc = refs
            kbias_ref = None
        ki = pl.program_id(1)

        @pl.when(ki == 0)
        def _init():
            m_sc[...] = jnp.full(m_sc.shape, -jnp.inf, jnp.float32)
            l_sc[...] = jnp.zeros(l_sc.shape, jnp.float32)
            acc_sc[...] = jnp.zeros(acc_sc.shape, jnp.float32)

        # scores = (Q*scale) K^T : contract last dims directly (no transpose).
        s = jax.lax.dot_general(
            qp_ref[...], kp_ref[...],
            dimension_numbers=(((1,), (1,)), ((), ())),
            preferred_element_type=jnp.float32)

        if has_kbias:
            # 0 for valid key columns, -1e30 for padded ones (only nonzero on
            # the last key tile); single VPU add per step.
            s = s + kbias_ref[...]

        # Online (flash-style) softmax update over the key axis.
        m_prev = m_sc[...]                                 # (TQ,128) replicated
        row_max = jnp.max(s, axis=1, keepdims=True)        # (TQ,1)
        m_new = jnp.maximum(m_prev, row_max)               # (TQ,128)
        alpha = jnp.exp(m_prev - m_new)                    # (TQ,128)
        p = jnp.exp(s - _lanes(m_new, reps_k))             # (TQ,TK)
        l_sc[...] = alpha * l_sc[...] + jnp.sum(p, axis=1, keepdims=True)
        acc_sc[...] = _lanes(alpha, reps_o) * acc_sc[...] + jnp.dot(
            p.astype(jnp.bfloat16), vp_ref[...],
            preferred_element_type=jnp.float32)
        m_sc[...] = m_new

        @pl.when(ki == n_k_tiles - 1)
        def _finalize():
            inv_l = 1.0 / l_sc[...]   # exact; runs once per q-tile
            o_ref[...] = (acc_sc[...] * _lanes(inv_l, reps_o)).astype(o_ref.dtype)

    return attn_kernel


def scaled_dot_attention(q, k, v, wq, wk, wv, bq, bk, bv, out_dim):
    """Pallas wrapper: hoisted Q/K/V projections + flash-style attention."""
    nq, in_dim = q.shape
    nk = k.shape[0]
    scale = 1.0 / math.sqrt(out_dim)

    tq_cap, tk_cap = _tile_caps()
    IN_P = _round_up(in_dim, 128)
    OUT_P = _round_up(out_dim, 128)
    TQ = min(tq_cap, _round_up(nq, 8))
    TK = min(tk_cap, _round_up(nk, 128))
    NQ_P = _round_up(nq, TQ)
    NK_P = _round_up(nk, TK)

    bf16 = jnp.bfloat16
    q_p = _pad2(q, NQ_P, IN_P).astype(bf16)
    k_p = _pad2(k, NK_P, IN_P).astype(bf16)
    v_p = _pad2(v, NK_P, IN_P).astype(bf16)
    wq_p = _pad2(wq, IN_P, OUT_P).astype(bf16)
    wk_p = _pad2(wk, IN_P, OUT_P).astype(bf16)
    wv_p = _pad2(wv, IN_P, OUT_P).astype(bf16)
    bq_p = _pad2(bq, 1, OUT_P).astype(jnp.float32)
    bk_p = _pad2(bk, 1, OUT_P).astype(jnp.float32)
    bv_p = _pad2(bv, 1, OUT_P).astype(jnp.float32)

    # Hoisted projections (computed once; scale folded into Q).
    qp = _linear_project(q_p, wq_p, bq_p, scale=scale, row_tile=TQ)
    kp = _linear_project(k_p, wk_p, bk_p, row_tile=TK)
    vp = _linear_project(v_p, wv_p, bv_p, row_tile=TK)

    grid = (NQ_P // TQ, NK_P // TK)
    has_kbias = NK_P != nk
    kernel = _make_attention_kernel(grid[1], TK, OUT_P, has_kbias)

    in_specs = [
        pl.BlockSpec((TQ, OUT_P), lambda qi, ki: (qi, 0)),   # projected Q
        pl.BlockSpec((TK, OUT_P), lambda qi, ki: (ki, 0)),   # projected K
        pl.BlockSpec((TK, OUT_P), lambda qi, ki: (ki, 0)),   # projected V
    ]
    inputs = [qp, kp, vp]
    if has_kbias:
        col = jnp.arange(NK_P, dtype=jnp.int32)[None, :]
        kbias = jnp.where(col < nk, 0.0, NEG_BIG).astype(jnp.float32)
        in_specs.append(pl.BlockSpec((1, TK), lambda qi, ki: (0, ki)))
        inputs.append(kbias)

    out_padded = pl.pallas_call(
        kernel,
        out_shape=jax.ShapeDtypeStruct((NQ_P, OUT_P), jnp.float32),
        grid_spec=pltpu.PrefetchScalarGridSpec(
            num_scalar_prefetch=0,
            grid=grid,
            in_specs=in_specs,
            out_specs=pl.BlockSpec((TQ, OUT_P), lambda qi, ki: (qi, 0)),
            scratch_shapes=[
                pltpu.VMEM((TQ, 128), jnp.float32),    # running max m (lane-dense)
                pltpu.VMEM((TQ, 128), jnp.float32),    # running denom l (lane-dense)
                pltpu.VMEM((TQ, OUT_P), jnp.float32),  # output accumulator
            ],
        ),
        compiler_params=pltpu.CompilerParams(
            dimension_semantics=("parallel", "arbitrary")),
    )(*inputs)

    return out_padded[:nq, :out_dim]


# ---------------------------------------------------------------------------
# References
# ---------------------------------------------------------------------------
def reference_f32(q, k, v, wq, wk, wv, bq, bk, bv, out_dim):
    query = q @ wq + bq
    key = k @ wk + bk
    value = v @ wv + bv
    scores = (query @ key.T) / math.sqrt(out_dim)
    p = jax.nn.softmax(scores, axis=1)
    return p @ value


def reference_bf16(q, k, v, wq, wk, wv, bq, bk, bv, out_dim):
    # Precision-matched reference: bf16 operands, f32 accumulation, scale
    # folded into the projected Q (as in the kernel).
    bf, f32 = jnp.bfloat16, jnp.float32
    scale = 1.0 / math.sqrt(out_dim)
    dot = lambda a, b: jnp.dot(a.astype(bf), b.astype(bf),
                               preferred_element_type=f32)
    query = ((dot(q, wq) + bq) * scale).astype(bf)
    key = (dot(k, wk) + bk).astype(bf)
    value = (dot(v, wv) + bv).astype(bf)
    scores = jnp.dot(query, key.T, preferred_element_type=f32)
    p = jax.nn.softmax(scores, axis=1)
    return jnp.dot(p.astype(bf), value, preferred_element_type=f32)


if __name__ == "__main__":
    # Small shapes consistent with the module (defaults in_dim=256, out_dim=64)
    in_dim, out_dim = 256, 64
    nq, nk = 8, 8

    key0 = jax.random.PRNGKey(0)
    kq, kk, kv, kwq, kwk, kwv, kbq, kbk, kbv = jax.random.split(key0, 9)

    q = jax.random.normal(kq, (nq, in_dim), dtype=jnp.float32)
    k = jax.random.normal(kk, (nk, in_dim), dtype=jnp.float32)
    v = jax.random.normal(kv, (nk, in_dim), dtype=jnp.float32)

    bound = 1.0 / math.sqrt(in_dim)
    wq = jax.random.uniform(kwq, (in_dim, out_dim), jnp.float32, -bound, bound)
    wk = jax.random.uniform(kwk, (in_dim, out_dim), jnp.float32, -bound, bound)
    wv = jax.random.uniform(kwv, (in_dim, out_dim), jnp.float32, -bound, bound)
    bq = jax.random.uniform(kbq, (1, out_dim), jnp.float32, -bound, bound)
    bk = jax.random.uniform(kbk, (1, out_dim), jnp.float32, -bound, bound)
    bv = jax.random.uniform(kbv, (1, out_dim), jnp.float32, -bound, bound)

    out = scaled_dot_attention(q, k, v, wq, wk, wv, bq, bk, bv, out_dim)
    out = jax.block_until_ready(out)
    assert out.shape == (nq, out_dim), out.shape

    # Tight check vs a precision-matched (bf16-operand) reference.
    ref_b = reference_bf16(q, k, v, wq, wk, wv, bq, bk, bv, out_dim)
    assert jnp.allclose(out, ref_b, atol=2e-3, rtol=2e-3), "mismatch vs bf16 reference"

    # Looser sanity check vs the full-f32 reference.
    ref_f = reference_f32(q, k, v, wq, wk, wv, bq, bk, bv, out_dim)
    assert jnp.allclose(out, ref_f, atol=3e-2, rtol=3e-2), "mismatch vs f32 reference"

    print("KERNEL_OK")
</pallas_src>

<mosaic_0001>
module attributes {stable_mosaic.version = 11 : i64} {
  func.func @proj_kernel(%arg0: i32, %arg1: memref<8x256xbf16, #tpu.memory_space<vmem>>, %arg2: memref<256x128xbf16, #tpu.memory_space<vmem>>, %arg3: memref<1x128xf32, #tpu.memory_space<vmem>>, %arg4: memref<8x128xbf16, #tpu.memory_space<vmem>>) attributes {dimension_semantics = [#tpu.dimension_semantics<parallel>], iteration_bounds = array<i64: 1>, scalar_prefetch = 0 : i64, scratch_operands = 0 : i64, tpu.core_type = #tpu.core_type<tc>, window_params = [{transform_indices = @transform_0, window_bounds = array<i64: 8, 256>}, {pipeline_mode = #tpu.pipeline_mode<synchronous>, transform_indices = @transform_1, window_bounds = array<i64: 256, 128>}, {pipeline_mode = #tpu.pipeline_mode<synchronous>, transform_indices = @transform_2, window_bounds = array<i64: 1, 128>}, {transform_indices = @transform_3, window_bounds = array<i64: 8, 128>}]} {
    %c0 = arith.constant 0 : index
    %c0_0 = arith.constant 0 : index
    %0 = vector.load %arg1[%c0, %c0_0] : memref<8x256xbf16, #tpu.memory_space<vmem>>, vector<8x256xbf16>
    %c0_1 = arith.constant 0 : index
    %c0_2 = arith.constant 0 : index
    %1 = vector.load %arg2[%c0_1, %c0_2] : memref<256x128xbf16, #tpu.memory_space<vmem>>, vector<256x128xbf16>
    %cst = arith.constant dense<0.000000e+00> : vector<8x128xf32>
    %2 = tpu.matmul %0, %1, %cst {dimension_numbers = #tpu.dot_dimension_numbers<[1], [0], [0], [1], [0, 0, 1, 1], [], []>} : vector<8x256xbf16>, vector<256x128xbf16>, vector<8x128xf32> -> vector<8x128xf32>
    %c0_3 = arith.constant 0 : index
    %c0_4 = arith.constant 0 : index
    %3 = vector.load %arg3[%c0_3, %c0_4] : memref<1x128xf32, #tpu.memory_space<vmem>>, vector<1x128xf32>
    %4 = vector.broadcast %3 : vector<1x128xf32> to vector<8x128xf32>
    %5 = arith.addf %2, %4 : vector<8x128xf32>
    %cst_5 = arith.constant 1.250000e-01 : f32
    %6 = vector.broadcast %cst_5 : f32 to vector<8x128xf32>
    %7 = arith.mulf %5, %6 : vector<8x128xf32>
    %8 = arith.truncf %7 : vector<8x128xf32> to vector<8x128xbf16>
    %c0_6 = arith.constant 0 : index
    %c0_7 = arith.constant 0 : index
    %9 = vector.load %arg4[%c0_6, %c0_7] : memref<8x128xbf16, #tpu.memory_space<vmem>>, vector<8x128xbf16>
    tpu.vector_store %arg4[%c0_6, %c0_7], %8 {strides = array<i32>} : memref<8x128xbf16, #tpu.memory_space<vmem>>, vector<8x128xbf16>,
    return
  }
  func.func @transform_0(%arg0: i32) -> (i32, i32) {
    %c0_i32 = arith.constant 0 : i32
    %c0_i32_0 = arith.constant 0 : i32
    return %arg0, %c0_i32 : i32, i32
  }
  func.func @transform_1(%arg0: i32) -> (i32, i32) {
    %c0_i32 = arith.constant 0 : i32
    %c0_i32_0 = arith.constant 0 : i32
    %c0_i32_1 = arith.constant 0 : i32
    return %c0_i32, %c0_i32_0 : i32, i32
  }
  func.func @transform_2(%arg0: i32) -> (i32, i32) {
    %c0_i32 = arith.constant 0 : i32
    %c0_i32_0 = arith.constant 0 : i32
    %c0_i32_1 = arith.constant 0 : i32
    return %c0_i32, %c0_i32_0 : i32, i32
  }
  func.func @transform_3(%arg0: i32) -> (i32, i32) {
    %c0_i32 = arith.constant 0 : i32
    %c0_i32_0 = arith.constant 0 : i32
    return %arg0, %c0_i32 : i32, i32
  }
}

</mosaic_0001>

<bundles_post_ra>
// kernel: tpu_custom_call.1
= control target key start
LH: loop header
LB: loop body
LE: loop exit
PB: predicated region body
PF: predicated region fallthrough
CT: control target
= control target key end

     0   :  { %8 = vsyncpa [#allocation3], 0  ;;  %s451_s0 = inlined_call_operand.hbm [shape: bf16[8,256], index: 0, kind: input, shape index: {}]   ;;  %s452_s1 = inlined_call_operand.hbm [shape: bf16[256,128], index: 1, kind: input, shape index: {}]   ;;  %s453_s2 = inlined_call_operand.vmem [shape: f32[1,128], index: 2, kind: input, shape index: {}]   ;;  %s454_s3 = inlined_call_operand.hbm [shape: bf16[8,128], index: 3, kind: output, shape index: {}]  }
   0x1   :  { %9 = vsyncpa [#allocation6], 0 }
   0x2   :  { %10 = vsyncpa [#allocation4], 0  ;;  %s380_s12 = smov [#allocation2]   ;;  %s381_s14 = smov [#allocation5]  }
   0x3   :  { %s17_s13 = sshll.u32 %s380_s12, 4  ;;  %s26_s15 = sshll.u32 %s381_s14, 4  ;;  %s18_s13 = int_to_ptr.vmem [resolvable:$true] %s17_s13  ;;  %s405_s15 = int_to_ptr.vmem [resolvable:$true] %s26_s15 }
   0x4   :  { %s308_s18 = scalar_lea.hbm %s451_s0, 128 }
   0x5   :  { %p309_p0 = scmp.ne.s32.totalorder %s451_s0, %s308_s18  ;;  %p312_p1 = scmp.lt.u32.totalorder %s308_s18, %s451_s0 }
   0x7   :  { %p314_p2 = pnand %p312_p1, %p309_p0 }
   0x9   :  { %317 = shalt.err (!%p314_p2)
}
   0xa   :  { %s318_s23 = scalar_lea.vmem %s18_s13, 128  ;;  %p323_p4 = scmp.lt.s32.totalorder %s18_s13, %s18_s13 }
   0xb   :  { %p319_p3 = scmp.ne.s32.totalorder %s18_s13, %s318_s23  ;;  %p324_p5 = scmp.lt.s32.totalorder %s318_s23, %s318_s23 }
   0xd   :  { %p325_p6 = por %p324_p5, %p323_p4 }
   0xf   :  { %p326_p7 = pnand %p325_p6, %p319_p3 }
  0x11   :  { %329 = shalt.err (!%p326_p7)
}
  0x12   :  { %20 = dma.hbm_to_vmem [thread:$0]  %s451_s0, 128, %s18_s13, [#allocation3]  }
  0x13   :  { %s330_s28 = scalar_lea.hbm %s452_s1, 2048 }
  0x14   :  { %p331_p8 = scmp.ne.s32.totalorder %s452_s1, %s330_s28  ;;  %p334_p9 = scmp.lt.u32.totalorder %s330_s28, %s452_s1 }
  0x16   :  { %p336_p10 = pnand %p334_p9, %p331_p8 }
  0x18   :  { %339 = shalt.err (!%p336_p10)
}
  0x19   :  { %s340_s6 = scalar_lea.vmem %s405_s15, 2048  ;;  %p345_p12 = scmp.lt.s32.totalorder %s405_s15, %s405_s15 }
  0x1a   :  { %p341_p11 = scmp.ne.s32.totalorder %s405_s15, %s340_s6  ;;  %p346_p13 = scmp.lt.s32.totalorder %s340_s6, %s340_s6 }
  0x1c   :  { %p347_p0 = por %p346_p13, %p345_p12 }
  0x1e   :  { %p348_p1 = pnand %p347_p0, %p341_p11 }
  0x20   :  { %351 = shalt.err (!%p348_p1)
}
  0x21   :  { %s382_s0 = smov 64   ;;  %s383_s7 = smov 4  }
  0x22   :  { %32 = dma.hbm_to_vmem [thread:$0]  %s452_s1, 2048, %s405_s15, [#allocation6], %s382_s0, %s382_s0, %s383_s7  }
  0x23   :  { %374 = dma.done.wait [#allocation3], 128  }
  0x24   :  { %375 = vsyncadd [#allocation3], 4294967168 }
  0x25   :  { %376 = dma.done.wait [#allocation6], 2048  }
  0x26   :  { %377 = vsyncadd [#allocation6], 4294965248  ;;  %v290_v0 = vld [vmem:[#allocation5 + $0x40] sm:$0xff]   ;;  %v292_v2 = vld [vmem:[#allocation5 + $0x48] sm:$0xff]   ;;  %s384_s11 = smov [#allocation7]  }
  0x27   :  { %v291_v1 = vld [vmem:[#allocation5] sm:$0xff]   ;;  %263 = vmatprep.subr.bf16.mxu0 %v290_v0  ;;  %v293_v3 = vld [vmem:[#allocation5 + $0x8] sm:$0xff]   ;;  %v294_v4 = vld [vmem:[#allocation5 + $0x50] sm:$0xff]   ;;  %s234_s12 = sshll.u32 %s384_s11, 4  ;;  %s235_s12 = int_to_ptr.vmem [resolvable:$true] %s234_s12 }
  0x28   :  { %264 = vmatpush3.bf16.msra.mxu0 %v291_v1  ;;  %v295_v5 = vld [vmem:[#allocation5 + $0x10] sm:$0xff]   ;;  %v296_v6 = vld [vmem:[#allocation5 + $0x58] sm:$0xff]   ;;  %v298_v8 = vld [vmem:[#allocation5 + $0x60] sm:$0xff]   ;;  %s352_s13 = scalar_lea.vmem %s235_s12, 64  ;;  %p357_p3 = scmp.lt.s32.totalorder %s235_s12, %s235_s12 }
  0x29   :  { %265 = vmatprep.subr.bf16.mxu0 %v292_v2  ;;  %v297_v7 = vld [vmem:[#allocation5 + $0x18] sm:$0xff]   ;;  %v299_v9 = vld [vmem:[#allocation5 + $0x20] sm:$0xff]   ;;  %v300_v10 = vld [vmem:[#allocation5 + $0x68] sm:$0xff]   ;;  %p353_p2 = scmp.ne.s32.totalorder %s235_s12, %s352_s13  ;;  %p358_p4 = scmp.lt.s32.totalorder %s352_s13, %s352_s13 }
  0x2a   :  { %v42_v11 = vld [vmem:[#allocation2] sm:$0xff]  ;;  %v301_v13 = vld [vmem:[#allocation5 + $0x28] sm:$0xff]   ;;  %v302_v14 = vld [vmem:[#allocation5 + $0x70] sm:$0xff]  }
  0x2b   :  { %v246_v12 = vcombine.high %v42_v11, %v42_v11  ;;  %v303_v15 = vld [vmem:[#allocation5 + $0x30] sm:$0xff]   ;;  %v304_v16 = vld [vmem:[#allocation5 + $0x78] sm:$0xff]   ;;  %v245_v18 = vcombine.low %v42_v11, %v42_v11  ;;  %p359_p5 = por %p358_p4, %p357_p3 }
  0x2c   :  { %266 = vmatpush3.bf16.msra.mxu0 %v293_v3  ;;  %v305_v17 = vld [vmem:[#allocation5 + $0x38] sm:$0xff]  }
  0x2d   :  { %267 = vmatprep.subr.bf16.mxu0 %v294_v4  ;;  %217 = vmatprep.mubr.bf16.mxu0 %v246_v12  ;;  %v244_v20 = vld [vmem:[%s453_s2] ss:$0 sm:$0xff]  ;;  %p360_p6 = pnand %p359_p5, %p353_p2 }
  0x30   :  { %268 = vmatpush3.bf16.msra.mxu0 %v295_v5 }
  0x31   :  { %269 = vmatprep.subr.bf16.mxu0 %v296_v6 }
  0x34   :  { %270 = vmatpush3.bf16.msra.mxu0 %v297_v7 }
  0x35   :  { %271 = vmatprep.subr.bf16.mxu0 %v298_v8 }
  0x38   :  { %272 = vmatpush3.bf16.msra.mxu0 %v299_v9 }
  0x39   :  { %273 = vmatprep.subr.bf16.mxu0 %v300_v10 }
  0x3c   :  { %274 = vmatpush3.bf16.msra.mxu0 %v301_v13 }
  0x3d   :  { %275 = vmatprep.subr.bf16.mxu0 %v302_v14 }
  0x40   :  { %276 = vmatpush3.bf16.msra.mxu0 %v303_v15 }
  0x41   :  { %277 = vmatprep.subr.bf16.mxu0 %v304_v16 }
  0x44   :  { %278 = vmatpush3.bf16.msra.mxu0 %v305_v17 }
  0x47   :  { %218 = vmatmul.mubr.bf16.vlgmr.msra.gmra.mrb[0].mxu0 %v245_v18 }
 0x11a   :  { %v279_v19 = vpop.f32.mrb[0].mxu0 }
 0x11b   :  { %v280_v21 = vpop.f32.mrb[1].mxu0 }
 0x11c   :  { %v281_v22 = vadd.f32 %v280_v21, %v279_v19  ;;  %v282_v23 = vpop.f32.mrb[2].mxu0 }
 0x11d   :  { %v283_v24 = vpop.f32.mrb[3].mxu0 }
 0x11e   :  { %v220_v25 = vadd.f32 %v281_v22, %v244_v20 }
 0x120   :  { %v225_v26 = vmul.f32 0.125, %v220_v25 }
 0x122   :  { %v226_v27 = vpack.c.bf16 %v225_v26, %v225_v26 }
 0x124   :  { %227 = vst [vmem:[#allocation7] sm:$0xf] %v226_v27 }
 0x125   :  { %363 = shalt.err (!%p360_p6)
}
 0x126   :  { %s364_s15 = scalar_lea.hbm %s454_s3, 64 }
 0x127   :  { %p365_p7 = scmp.ne.s32.totalorder %s454_s3, %s364_s15  ;;  %p368_p8 = scmp.lt.u32.totalorder %s364_s15, %s454_s3 }
 0x129   :  { %p370_p9 = pnand %p368_p8, %p365_p7 }
 0x12b   :  { %373 = shalt.err (!%p370_p9)
}
 0x12c   :  { %237 = dma.vmem_to_hbm [thread:$0]  %s235_s12, 64, %s454_s3, [#allocation4]  }
 0x12d   :  { %378 = dma.done.wait [#allocation4], 64  }
 0x12e   :  { %379 = vsyncadd [#allocation4], 4294967232 }
 0x12f   :  { %241 = vsyncpa [#allocation3], 1 }
 0x130   :  { %242 = vsyncpa [#allocation6], 1 }
 0x131   :  { %243 = vsyncpa [#allocation4], 1 }

</bundles_post_ra>
